<compile_context>
chip_gen: v6e
topology: v6e:2x2x1
jax: 0.10.0
libtpu: 0.0.40
codegen_flags: <defaults>
</compile_context>

<pallas_src>
import jax
import jax.numpy as jnp
from jax import lax
from jax.experimental import pallas as pl
from jax.experimental.pallas import tpu as pltpu

K = 3  # fixed Conv2d kernel: 3x3, stride 1, padding 1 ("same")


def _make_conv3x3_flatten_kernel(C_in, C_out, H, W):
    HW = H * W

    def kernel(x_ref, w_ref, b_ref, o_ref):
        # x_ref: (C_in, LPAD)  one sample, H-padded + spatially flattened, with
        #        a leading zero guard lane and trailing zero lanes so every
        #        shifted window read below stays in bounds.
        # w_ref: (K*K, C_out, C_in)  conv weight, leading index k = kh*K + kw.
        # b_ref: (C_out, 1)
        # o_ref: (C_out, H*W)  lane-dense (multiple of 128), already in the
        #        torch.flatten(NCHW, 1) per-sample layout.
        xf = x_ref[...]                                   # (C_in, LPAD)

        # Within-row column index of every output lane; lanes whose shifted
        # read wrapped across a row boundary correspond to the conv's
        # left/right zero padding and are masked to zero.  Hoisted out of the
        # 3x3 loop (computed once per grid step).
        col = lax.broadcasted_iota(jnp.int32, (C_in, HW), 1) % W
        not_left = col != 0
        not_right = col != W - 1

        # Bias folded into the accumulator init.
        acc = jnp.broadcast_to(b_ref[...], (C_out, HW)).astype(jnp.float32)

        for kh in range(K):
            for kw in range(K):
                s = kh * W + kw                           # static shift (0..2W+2)
                slab = xf[:, s:s + HW]                    # (C_in, HW) shifted window
                if kw == 0:
                    slab = jnp.where(not_left, slab, 0.0)
                elif kw == K - 1:
                    slab = jnp.where(not_right, slab, 0.0)
                wk = w_ref[kh * K + kw]                   # (C_out, C_in)
                acc = acc + jnp.dot(wk, slab, preferred_element_type=jnp.float32)

        o_ref[...] = acc.astype(o_ref.dtype)

    return kernel


def conv3x3_flatten_pallas(x, weight, bias):
    """Fused Conv2d(3x3, stride 1, 'same', bias) + torch.flatten(x, 1)."""
    N, C_in, H, W = x.shape
    C_out = weight.shape[0]
    assert weight.shape == (C_out, C_in, K, K)
    HW = H * W
    Hp = H + 2

    # Flattened, guard-padded length: 1 leading zero + (H+2)*W values +
    # trailing zeros, rounded up to a multiple of 128 lanes so all 9 shifted
    # windows (max end index HW + 2W + 1) stay in bounds.
    need = HW + 2 * W + 2
    LPAD = 128 * pl.cdiv(need, 128)

    xph = jnp.pad(x, ((0, 0), (0, 0), (1, 1), (0, 0)))            # (N, C, H+2, W)
    xf = xph.reshape(N, C_in, Hp * W)
    xf = jnp.pad(xf, ((0, 0), (0, 0), (1, LPAD - 1 - Hp * W)))    # (N, C, LPAD)

    # Weight reordered so w9[kh*K + kw] == weight[:, :, kh, kw].
    w9 = weight.transpose(2, 3, 0, 1).reshape(K * K, C_out, C_in)
    b2 = bias.reshape(C_out, 1)

    kernel = _make_conv3x3_flatten_kernel(C_in, C_out, H, W)
    y = pl.pallas_call(
        kernel,
        out_shape=jax.ShapeDtypeStruct((N, C_out, HW), x.dtype),
        grid_spec=pltpu.PrefetchScalarGridSpec(
            num_scalar_prefetch=0,
            grid=(N,),  # one step per sample
            in_specs=[
                pl.BlockSpec((None, C_in, LPAD), lambda n: (n, 0, 0)),
                # Grid-invariant residents: constant block index -> weight /
                # bias are not re-DMA'd between grid steps.
                pl.BlockSpec((K * K, C_out, C_in), lambda n: (0, 0, 0)),
                pl.BlockSpec((C_out, 1), lambda n: (0, 0)),
            ],
            out_specs=pl.BlockSpec((None, C_out, HW), lambda n: (n, 0, 0)),
        ),
        compiler_params=pltpu.CompilerParams(
            dimension_semantics=("parallel",),  # batch split across TCs
        ),
    )(xf, w9, b2)

    # (N, C_out, H*W) row-major == torch.flatten(NCHW conv output, 1): the
    # final flatten is a free reshape.
    return y.reshape(N, C_out * HW)


@jax.jit
def flatten_forward(x, weight, bias):
    """Equivalent of: x = Conv2d(x); x = torch.flatten(x, 1)."""
    return conv3x3_flatten_pallas(x, weight, bias)


if __name__ == "__main__":
    key = jax.random.PRNGKey(0)
    kx, kw_, kb = jax.random.split(key, 3)

    N, C_in, H, W = 2, 4, 16, 16
    C_out = 8

    x = jax.random.normal(kx, (N, C_in, H, W), dtype=jnp.float32)
    # Deterministic synthetic "parameters" (the wrapped model is arbitrary in
    # the reference code; instantiated here as a fixed Conv2d).
    fan_in = C_in * K * K
    weight = jax.random.normal(kw_, (C_out, C_in, K, K), dtype=jnp.float32) / jnp.sqrt(fan_in)
    bias = jax.random.normal(kb, (C_out,), dtype=jnp.float32) * 0.1

    out = flatten_forward(x, weight, bias)
    jax.block_until_ready(out)

    assert out.shape == (N, C_out * H * W), out.shape

    # Sanity check against a pure-JAX conv reference (NCHW) + flatten.
    ref = lax.conv_general_dilated(
        x, weight, window_strides=(1, 1), padding="SAME",
        dimension_numbers=("NCHW", "OIHW", "NCHW"),
    ) + bias.reshape(1, C_out, 1, 1)
    ref = ref.reshape(N, -1)
    assert jnp.allclose(out, ref, atol=1e-4, rtol=1e-4), float(jnp.max(jnp.abs(out - ref)))

    print("KERNEL_OK")
</pallas_src>

<mosaic_0001>
module attributes {stable_mosaic.version = 11 : i64} {
  func.func @kernel(%arg0: i32, %arg1: memref<1x4x384xf32, #tpu.memory_space<vmem>>, %arg2: memref<9x8x4xf32, #tpu.memory_space<vmem>>, %arg3: memref<8x1xf32, #tpu.memory_space<vmem>>, %arg4: memref<1x8x256xf32, #tpu.memory_space<vmem>>) attributes {dimension_semantics = [#tpu.dimension_semantics<parallel>], iteration_bounds = array<i64: 2>, scalar_prefetch = 0 : i64, scratch_operands = 0 : i64, tpu.core_type = #tpu.core_type<tc>, window_params = [{transform_indices = @transform_0, window_bounds = array<i64: 1, 4, 384>}, {pipeline_mode = #tpu.pipeline_mode<synchronous>, transform_indices = @transform_1, window_bounds = array<i64: 9, 8, 4>}, {pipeline_mode = #tpu.pipeline_mode<synchronous>, transform_indices = @transform_2, window_bounds = array<i64: 8, 1>}, {transform_indices = @transform_3, window_bounds = array<i64: 1, 8, 256>}]} {
    %c0 = arith.constant 0 : index
    %c0_0 = arith.constant 0 : index
    %c0_1 = arith.constant 0 : index
    %0 = vector.load %arg1[%c0, %c0_0, %c0_1] : memref<1x4x384xf32, #tpu.memory_space<vmem>>, vector<1x4x384xf32>
    %1 = vector.shape_cast %0 : vector<1x4x384xf32> to vector<4x384xf32>
    %2 = tpu.iota {dimensions = array<i32: 1>} : vector<4x256xi32>
    %c16_i32 = arith.constant 16 : i32
    %c0_i32 = arith.constant 0 : i32
    %3 = arith.cmpi eq, %c16_i32, %c0_i32 : i32
    %c1_i32 = arith.constant 1 : i32
    %4 = arith.select %3, %c1_i32, %c16_i32 : i32
    %5 = vector.broadcast %4 : i32 to vector<4x256xi32>
    %6 = arith.remsi %2, %5 : vector<4x256xi32>
    %c0_i32_2 = arith.constant 0 : i32
    %7 = vector.broadcast %c0_i32_2 : i32 to vector<4x256xi32>
    %8 = arith.cmpi ne, %6, %7 : vector<4x256xi32>
    %c0_i32_3 = arith.constant 0 : i32
    %9 = vector.broadcast %c0_i32_3 : i32 to vector<4x256xi32>
    %10 = arith.cmpi slt, %6, %9 : vector<4x256xi32>
    %c0_i32_4 = arith.constant 0 : i32
    %11 = arith.cmpi slt, %4, %c0_i32_4 : i32
    %12 = vector.broadcast %11 : i1 to vector<4x256xi1>
    %13 = vector.broadcast %12 : vector<4x256xi1> to vector<4x256xi1>
    %14 = arith.xori %10, %13 : vector<4x256xi1>
    %15 = arith.andi %14, %8 : vector<4x256xi1>
    %16 = vector.broadcast %4 : i32 to vector<4x256xi32>
    %17 = arith.addi %6, %16 : vector<4x256xi32>
    %18 = arith.select %15, %17, %6 : vector<4x256xi1>, vector<4x256xi32>
    %c0_i32_5 = arith.constant 0 : i32
    %19 = vector.broadcast %c0_i32_5 : i32 to vector<4x256xi32>
    %20 = arith.cmpi ne, %18, %19 : vector<4x256xi32>
    %c15_i32 = arith.constant 15 : i32
    %21 = vector.broadcast %c15_i32 : i32 to vector<4x256xi32>
    %22 = arith.cmpi ne, %18, %21 : vector<4x256xi32>
    %c0_6 = arith.constant 0 : index
    %c0_7 = arith.constant 0 : index
    %23 = vector.load %arg3[%c0_6, %c0_7] : memref<8x1xf32, #tpu.memory_space<vmem>>, vector<8x1xf32>
    %24 = vector.shape_cast %23 : vector<8x1xf32> to vector<8x1xf32>
    %25 = vector.broadcast %24 : vector<8x1xf32> to vector<8x256xf32>
    %26 = vector.extract_strided_slice %1 {offsets = [0, 0], sizes = [4, 256], strides = [1, 1]} : vector<4x384xf32> to vector<4x256xf32>
    %cst = arith.constant 0.000000e+00 : f32
    %27 = vector.broadcast %cst : f32 to vector<4x256xf32>
    %28 = arith.select %20, %26, %27 : vector<4x256xi1>, vector<4x256xf32>
    %c0_8 = arith.constant 0 : index
    %c0_9 = arith.constant 0 : index
    %c0_10 = arith.constant 0 : index
    %29 = vector.load %arg2[%c0_8, %c0_9, %c0_10] : memref<9x8x4xf32, #tpu.memory_space<vmem>>, vector<1x8x4xf32>
    %30 = vector.shape_cast %29 : vector<1x8x4xf32> to vector<8x4xf32>
    %cst_11 = arith.constant dense<0.000000e+00> : vector<8x256xf32>
    %31 = tpu.matmul %30, %28, %cst_11 {dimension_numbers = #tpu.dot_dimension_numbers<[1], [0], [0], [1], [0, 0, 1, 1], [], []>} : vector<8x4xf32>, vector<4x256xf32>, vector<8x256xf32> -> vector<8x256xf32>
    %32 = arith.addf %25, %31 : vector<8x256xf32>
    %33 = vector.extract_strided_slice %1 {offsets = [0, 1], sizes = [4, 256], strides = [1, 1]} : vector<4x384xf32> to vector<4x256xf32>
    %c1 = arith.constant 1 : index
    %c0_12 = arith.constant 0 : index
    %c0_13 = arith.constant 0 : index
    %34 = vector.load %arg2[%c1, %c0_12, %c0_13] : memref<9x8x4xf32, #tpu.memory_space<vmem>>, vector<1x8x4xf32>
    %35 = vector.shape_cast %34 : vector<1x8x4xf32> to vector<8x4xf32>
    %cst_14 = arith.constant dense<0.000000e+00> : vector<8x256xf32>
    %36 = tpu.matmul %35, %33, %cst_14 {dimension_numbers = #tpu.dot_dimension_numbers<[1], [0], [0], [1], [0, 0, 1, 1], [], []>} : vector<8x4xf32>, vector<4x256xf32>, vector<8x256xf32> -> vector<8x256xf32>
    %37 = arith.addf %32, %36 : vector<8x256xf32>
    %38 = vector.extract_strided_slice %1 {offsets = [0, 2], sizes = [4, 256], strides = [1, 1]} : vector<4x384xf32> to vector<4x256xf32>
    %cst_15 = arith.constant 0.000000e+00 : f32
    %39 = vector.broadcast %cst_15 : f32 to vector<4x256xf32>
    %40 = arith.select %22, %38, %39 : vector<4x256xi1>, vector<4x256xf32>
    %c2 = arith.constant 2 : index
    %c0_16 = arith.constant 0 : index
    %c0_17 = arith.constant 0 : index
    %41 = vector.load %arg2[%c2, %c0_16, %c0_17] : memref<9x8x4xf32, #tpu.memory_space<vmem>>, vector<1x8x4xf32>
    %42 = vector.shape_cast %41 : vector<1x8x4xf32> to vector<8x4xf32>
    %cst_18 = arith.constant dense<0.000000e+00> : vector<8x256xf32>
    %43 = tpu.matmul %42, %40, %cst_18 {dimension_numbers = #tpu.dot_dimension_numbers<[1], [0], [0], [1], [0, 0, 1, 1], [], []>} : vector<8x4xf32>, vector<4x256xf32>, vector<8x256xf32> -> vector<8x256xf32>
    %44 = arith.addf %37, %43 : vector<8x256xf32>
    %45 = vector.extract_strided_slice %1 {offsets = [0, 16], sizes = [4, 256], strides = [1, 1]} : vector<4x384xf32> to vector<4x256xf32>
    %cst_19 = arith.constant 0.000000e+00 : f32
    %46 = vector.broadcast %cst_19 : f32 to vector<4x256xf32>
    %47 = arith.select %20, %45, %46 : vector<4x256xi1>, vector<4x256xf32>
    %c3 = arith.constant 3 : index
    %c0_20 = arith.constant 0 : index
    %c0_21 = arith.constant 0 : index
    %48 = vector.load %arg2[%c3, %c0_20, %c0_21] : memref<9x8x4xf32, #tpu.memory_space<vmem>>, vector<1x8x4xf32>
    %49 = vector.shape_cast %48 : vector<1x8x4xf32> to vector<8x4xf32>
    %cst_22 = arith.constant dense<0.000000e+00> : vector<8x256xf32>
    %50 = tpu.matmul %49, %47, %cst_22 {dimension_numbers = #tpu.dot_dimension_numbers<[1], [0], [0], [1], [0, 0, 1, 1], [], []>} : vector<8x4xf32>, vector<4x256xf32>, vector<8x256xf32> -> vector<8x256xf32>
    %51 = arith.addf %44, %50 : vector<8x256xf32>
    %52 = vector.extract_strided_slice %1 {offsets = [0, 17], sizes = [4, 256], strides = [1, 1]} : vector<4x384xf32> to vector<4x256xf32>
    %c4 = arith.constant 4 : index
    %c0_23 = arith.constant 0 : index
    %c0_24 = arith.constant 0 : index
    %53 = vector.load %arg2[%c4, %c0_23, %c0_24] : memref<9x8x4xf32, #tpu.memory_space<vmem>>, vector<1x8x4xf32>
    %54 = vector.shape_cast %53 : vector<1x8x4xf32> to vector<8x4xf32>
    %cst_25 = arith.constant dense<0.000000e+00> : vector<8x256xf32>
    %55 = tpu.matmul %54, %52, %cst_25 {dimension_numbers = #tpu.dot_dimension_numbers<[1], [0], [0], [1], [0, 0, 1, 1], [], []>} : vector<8x4xf32>, vector<4x256xf32>, vector<8x256xf32> -> vector<8x256xf32>
    %56 = arith.addf %51, %55 : vector<8x256xf32>
    %57 = vector.extract_strided_slice %1 {offsets = [0, 18], sizes = [4, 256], strides = [1, 1]} : vector<4x384xf32> to vector<4x256xf32>
    %cst_26 = arith.constant 0.000000e+00 : f32
    %58 = vector.broadcast %cst_26 : f32 to vector<4x256xf32>
    %59 = arith.select %22, %57, %58 : vector<4x256xi1>, vector<4x256xf32>
    %c5 = arith.constant 5 : index
    %c0_27 = arith.constant 0 : index
    %c0_28 = arith.constant 0 : index
    %60 = vector.load %arg2[%c5, %c0_27, %c0_28] : memref<9x8x4xf32, #tpu.memory_space<vmem>>, vector<1x8x4xf32>
    %61 = vector.shape_cast %60 : vector<1x8x4xf32> to vector<8x4xf32>
    %cst_29 = arith.constant dense<0.000000e+00> : vector<8x256xf32>
    %62 = tpu.matmul %61, %59, %cst_29 {dimension_numbers = #tpu.dot_dimension_numbers<[1], [0], [0], [1], [0, 0, 1, 1], [], []>} : vector<8x4xf32>, vector<4x256xf32>, vector<8x256xf32> -> vector<8x256xf32>
    %63 = arith.addf %56, %62 : vector<8x256xf32>
    %64 = vector.extract_strided_slice %1 {offsets = [0, 32], sizes = [4, 256], strides = [1, 1]} : vector<4x384xf32> to vector<4x256xf32>
    %cst_30 = arith.constant 0.000000e+00 : f32
    %65 = vector.broadcast %cst_30 : f32 to vector<4x256xf32>
    %66 = arith.select %20, %64, %65 : vector<4x256xi1>, vector<4x256xf32>
    %c6 = arith.constant 6 : index
    %c0_31 = arith.constant 0 : index
    %c0_32 = arith.constant 0 : index
    %67 = vector.load %arg2[%c6, %c0_31, %c0_32] : memref<9x8x4xf32, #tpu.memory_space<vmem>>, vector<1x8x4xf32>
    %68 = vector.shape_cast %67 : vector<1x8x4xf32> to vector<8x4xf32>
    %cst_33 = arith.constant dense<0.000000e+00> : vector<8x256xf32>
    %69 = tpu.matmul %68, %66, %cst_33 {dimension_numbers = #tpu.dot_dimension_numbers<[1], [0], [0], [1], [0, 0, 1, 1], [], []>} : vector<8x4xf32>, vector<4x256xf32>, vector<8x256xf32> -> vector<8x256xf32>
    %70 = arith.addf %63, %69 : vector<8x256xf32>
    %71 = vector.extract_strided_slice %1 {offsets = [0, 33], sizes = [4, 256], strides = [1, 1]} : vector<4x384xf32> to vector<4x256xf32>
    %c7 = arith.constant 7 : index
    %c0_34 = arith.constant 0 : index
    %c0_35 = arith.constant 0 : index
    %72 = vector.load %arg2[%c7, %c0_34, %c0_35] : memref<9x8x4xf32, #tpu.memory_space<vmem>>, vector<1x8x4xf32>
    %73 = vector.shape_cast %72 : vector<1x8x4xf32> to vector<8x4xf32>
    %cst_36 = arith.constant dense<0.000000e+00> : vector<8x256xf32>
    %74 = tpu.matmul %73, %71, %cst_36 {dimension_numbers = #tpu.dot_dimension_numbers<[1], [0], [0], [1], [0, 0, 1, 1], [], []>} : vector<8x4xf32>, vector<4x256xf32>, vector<8x256xf32> -> vector<8x256xf32>
    %75 = arith.addf %70, %74 : vector<8x256xf32>
    %76 = vector.extract_strided_slice %1 {offsets = [0, 34], sizes = [4, 256], strides = [1, 1]} : vector<4x384xf32> to vector<4x256xf32>
    %cst_37 = arith.constant 0.000000e+00 : f32
    %77 = vector.broadcast %cst_37 : f32 to vector<4x256xf32>
    %78 = arith.select %22, %76, %77 : vector<4x256xi1>, vector<4x256xf32>
    %c8 = arith.constant 8 : index
    %c0_38 = arith.constant 0 : index
    %c0_39 = arith.constant 0 : index
    %79 = vector.load %arg2[%c8, %c0_38, %c0_39] : memref<9x8x4xf32, #tpu.memory_space<vmem>>, vector<1x8x4xf32>
    %80 = vector.shape_cast %79 : vector<1x8x4xf32> to vector<8x4xf32>
    %cst_40 = arith.constant dense<0.000000e+00> : vector<8x256xf32>
    %81 = tpu.matmul %80, %78, %cst_40 {dimension_numbers = #tpu.dot_dimension_numbers<[1], [0], [0], [1], [0, 0, 1, 1], [], []>} : vector<8x4xf32>, vector<4x256xf32>, vector<8x256xf32> -> vector<8x256xf32>
    %82 = arith.addf %75, %81 : vector<8x256xf32>
    %c0_41 = arith.constant 0 : index
    %c0_42 = arith.constant 0 : index
    %c0_43 = arith.constant 0 : index
    %83 = vector.load %arg4[%c0_41, %c0_42, %c0_43] : memref<1x8x256xf32, #tpu.memory_space<vmem>>, vector<1x8x256xf32>
    %84 = vector.shape_cast %83 : vector<1x8x256xf32> to vector<8x256xf32>
    %85 = vector.shape_cast %82 : vector<8x256xf32> to vector<1x8x256xf32>
    tpu.vector_store %arg4[%c0_41, %c0_42, %c0_43], %85 {strides = array<i32>} : memref<1x8x256xf32, #tpu.memory_space<vmem>>, vector<1x8x256xf32>,
    return
  }
  func.func @transform_0(%arg0: i32) -> (i32, i32, i32) {
    %c0_i32 = arith.constant 0 : i32
    %c0_i32_0 = arith.constant 0 : i32
    %c0_i32_1 = arith.constant 0 : i32
    return %arg0, %c0_i32, %c0_i32_0 : i32, i32, i32
  }
  func.func @transform_1(%arg0: i32) -> (i32, i32, i32) {
    %c0_i32 = arith.constant 0 : i32
    %c0_i32_0 = arith.constant 0 : i32
    %c0_i32_1 = arith.constant 0 : i32
    %c0_i32_2 = arith.constant 0 : i32
    return %c0_i32, %c0_i32_0, %c0_i32_1 : i32, i32, i32
  }
  func.func @transform_2(%arg0: i32) -> (i32, i32) {
    %c0_i32 = arith.constant 0 : i32
    %c0_i32_0 = arith.constant 0 : i32
    %c0_i32_1 = arith.constant 0 : i32
    return %c0_i32, %c0_i32_0 : i32, i32
  }
  func.func @transform_3(%arg0: i32) -> (i32, i32, i32) {
    %c0_i32 = arith.constant 0 : i32
    %c0_i32_0 = arith.constant 0 : i32
    %c0_i32_1 = arith.constant 0 : i32
    return %arg0, %c0_i32, %c0_i32_0 : i32, i32, i32
  }
}

</mosaic_0001>

<bundles_post_ra>
// kernel: flatten_forward.1
= control target key start
LH: loop header
LB: loop body
LE: loop exit
PB: predicated region body
PF: predicated region fallthrough
CT: control target
= control target key end

     0   :  { %s1221_s12 = smov 0   ;;  %s1357_s0 = inlined_call_operand.vmem [shape: f32[2,4,384], index: 0, kind: input, shape index: {}]   ;;  %s1358_s1 = inlined_call_operand.vmem [shape: f32[9,8,4], index: 1, kind: input, shape index: {}]   ;;  %s1359_s2 = inlined_call_operand.vmem [shape: f32[8,1], index: 2, kind: input, shape index: {}]   ;;  %s1360_s3 = inlined_call_operand.vmem [shape: f32[2,8,256], index: 3, kind: output, shape index: {}]  }
   0x1 LB: > { %s1116_s13 = sadd.s32 4294967295, %s1189_s12   ;;  %p1120_p0 = scmp.ge.s32.totalorder %s1189_s12, 1  ;;  %s1189_s12 = sphi %s1221_s12, %s13_s12  }
   0x2   : > { %p137_p1 = scmp.lt.s32.totalorder %s1189_s12, 3 }
   0x4   : > { %p138_p2 = pnand %p1120_p0, %p137_p1 }
   0x5   : > { %p161_p3 = scmp.lt.s32.totalorder (!%p138_p2), %s1116_s13, 1  ;;  %s1192_s18 = smov (!%p138_p2), 127  }
   0x6   : > { %141 = sbr.rel (%p138_p2) target bundleno = 378 (0x17a), region = 32  ;;  %s1193_s21 = smov (!%p138_p2), 126  }
   0x7   : > { %s1194_s22 = smov (!%p138_p2), 112   ;;  %s1195_s23 = smov (!%p138_p2), 111  }
   0x8   : > { %s1196_s24 = smov (!%p138_p2), 110   ;;  %s1197_s25 = smov (!%p138_p2), 96  }
   0x9   : > { %s1198_s26 = smov (!%p138_p2), 95   ;;  %s1200_s27 = smov (!%p138_p2), 94  }
   0xb   : > { %v173_v0 = vlaneseq  ;;  %s1370_s13 = smov (!%p161_p3, %s1116_s13), 1  ;;  %v1191_v4 = vmov 0.0   ;;  %vm220_vm2 = vcmask 1043456   ;;  %v215_v13 = vld [vmem:[%s1358_s1] sm:$0xff]  ;;  %vm216_vm3 = vcmask 31744   ;;  %v1127_v28 = vld [vmem:[%s1358_s1 + $0x8] sm:$0xff] }
   0xc   : > { %s1162_s14 = smul.u32 12, %s1370_s13  ;;  %291 = vmatprep.mubr.f32.mxu0 %v1191_v4  ;;  %383 = vmatprep.mubr.f32.mxu1 %v1191_v4  ;;  %v1199_v14 = vmov 0   ;;  %v204_v15 = vld [vmem:[%s1359_s2] sm:$0xff]  ;;  %vm398_vm4 = vcmask 1031168   ;;  %vm309_vm5 = vcmask 1039360   ;;  %vm495_vm8 = vcmask 916480  }
   0xd   : > { %v1231_v1 = vand.u32 127, %v173_v0  ;;  %1181 = vset.pattern.permute.xlu0 %v1199_v14  ;;  %v1131_v31 = vld [vmem:[%s1358_s1 + $0x10] sm:$0xff]  ;;  %v1135_v39 = vld [vmem:[%s1358_s1 + $0x18] sm:$0xff]  ;;  %vm594_vm9 = vcmask 908288   ;;  %v1139_v45 = vld [vmem:[%s1358_s1 + $0x20] sm:$0xff]  ;;  %vm683_vm10 = vcmask 900096  }
   0xe   : > { %s165_s17 = scalar_lea.vmem %s1357_s0, %s1162_s14  ;;  %v1143_v53 = vld [vmem:[%s1358_s1 + $0x28] sm:$0xff]  ;;  %vm780_vm11 = vcmask 785408   ;;  %vm879_vm12 = vcmask 777216   ;;  %v1147_v61 = vld [vmem:[%s1358_s1 + $0x30] sm:$0xff]  ;;  %vm968_vm13 = vcmask 769024  }
   0xf   : > { %v1235_v2 = vadd.s32 128, %v1231_v1  ;;  %v180_v3 = vand.u32 15, %v1231_v1  ;;  %v172_v6 = vld [vmem:[%s165_s17 + $0x8] sm:$0xf]  ;;  %v171_v7 = vld [vmem:[%s165_s17] sm:$0xff] }
  0x10   : > { %307 = vrot.lane.b32.xlu0 %v172_v6, %s1192_s18  ;;  %303 = vrot.lane.b32.xlu1 %v171_v7, %s1192_s18  ;;  %v211_v9 = vcombine.high %v171_v7, %v171_v7 }
  0x11   : > { %v187_v5 = vand.u32 15, %v1235_v2  ;;  %vm1244_vm0 = vcmp.ne.s32.totalorder %v180_v3, 0  ;;  %vm1266_vm6 = vcmp.ne.s32.totalorder %v180_v3, 15  ;;  %v1151_v3 = vld [vmem:[%s1358_s1 + $0x38] sm:$0xff] }
  0x12   : > { %v213_v12 = vsel %vm1244_vm0, %v171_v7, 0.0 }
  0x13   : > { %vm1248_vm1 = vcmp.ne.s32.totalorder %v187_v5, 0  ;;  %vm1270_vm7 = vcmp.ne.s32.totalorder %v187_v5, 15 }
  0x14   : > { %v214_v11 = vsel %vm1248_vm1, %v211_v9, 0.0  ;;  %396 = vrot.lane.b32.xlu0 %v172_v6, %s1193_s21  ;;  %392 = vrot.lane.b32.xlu1 %v171_v7, %s1193_s21 }
  0x15   : > { %1124 = vmatprep.subr.msk.mxu0 %vm220_vm2, %v214_v11  ;;  %v1155_v11 = vld [vmem:[%s1358_s1 + $0x40] sm:$0xff] }
  0x16   : > { %1125 = vmatpush1.msk.msra.mxu0 %vm220_vm2, %v213_v12 }
  0x17   : > { %1126 = vmatmul.mubr.msk.f32.vlgmr.msra.gmra.mxu0 %vm216_vm3, %v215_v13 }
  0x18   : > { %480 = vmatprep.mubr.f32.mxu0 %v1191_v4  ;;  %394 = vrot.lane.b32.xlu1 %v211_v9, %s1193_s21  ;;  %s1161_s21 = sshll.u32 %s1370_s13, 4 }
  0x19   : > { %305 = vrot.lane.b32.xlu0 %v211_v9, %s1192_s18 }
  0x1c   : > { %493 = vrot.lane.b32.xlu1 %v172_v6, %s1194_s22 }
  0x1d   : > { %491 = vrot.lane.b32.xlu0 %v211_v9, %s1194_s22 }
  0x20   : > { %590 = vrot.lane.b32.xlu1 %v211_v9, %s1195_s23 }
  0x21   : > { %489 = vrot.lane.b32.xlu0 %v171_v7, %s1194_s22 }
  0x24   : > { %588 = vrot.lane.b32.xlu1 %v171_v7, %s1195_s23 }
  0x25   : > { %592 = vrot.lane.b32.xlu0 %v172_v6, %s1195_s23 }
  0x28   : > { %681 = vrot.lane.b32.xlu1 %v172_v6, %s1196_s24 }
  0x29   : > { %679 = vrot.lane.b32.xlu0 %v211_v9, %s1196_s24 }
  0x2c   : > { %776 = vrot.lane.b32.xlu1 %v211_v9, %s1197_s25 }
  0x2d   : > { %677 = vrot.lane.b32.xlu0 %v171_v7, %s1196_s24  ;;  %s170_s24 = scalar_lea.vmem %s1360_s3, %s1161_s21 }
  0x30   : > { %774 = vrot.lane.b32.xlu1 %v171_v7, %s1197_s25 }
  0x31   : > { %778 = vrot.lane.b32.xlu0 %v172_v6, %s1197_s25 }
  0x34   : > { %877 = vrot.lane.b32.xlu1 %v172_v6, %s1198_s26 }
  0x35   : > { %875 = vrot.lane.b32.xlu0 %v211_v9, %s1198_s26 }
  0x38   : > { %964 = vrot.lane.b32.xlu1 %v211_v9, %s1200_s27 }
  0x39   : > { %873 = vrot.lane.b32.xlu0 %v171_v7, %s1198_s26 }
  0x3c   : > { %962 = vrot.lane.b32.xlu1 %v171_v7, %s1200_s27 }
  0x3d   : > { %966 = vrot.lane.b32.xlu0 %v172_v6, %s1200_s27 }
  0x41   : > { %207 = vperm.xlu0 %1181, %v204_v15  }
  0x82   : > { %v308_v16 = vpop.permute.xlu0 %307  ;;  %v304_v17 = vpop.permute.xlu1 %303 }
  0x86   : > { %v397_v18 = vpop.permute.xlu0 %396  ;;  %v393_v19 = vpop.permute.xlu1 %392 }
  0x8a   : > { %v395_v22 = vpop.permute.xlu1 %394 }
  0x8b   : > { %v306_v23 = vpop.permute.xlu0 %305  ;;  %v399_v24 = vsel %vm398_vm4, %v393_v19, %v395_v22  ;;  %v400_v25 = vsel %vm398_vm4, %v395_v22, %v397_v18 }
  0x8c   : > { %v311_v26 = vsel %vm309_vm5, %v306_v23, %v308_v16  ;;  %v310_v27 = vsel %vm309_vm5, %v304_v17, %v306_v23  ;;  %v403_v29 = vsel %vm1266_vm6, %v399_v24, 0.0  ;;  %v404_v30 = vsel %vm1270_vm7, %v400_v25, 0.0 }
  0x8d   : > { %1128 = vmatprep.subr.msk.mxu1 %vm220_vm2, %v311_v26  ;;  %1132 = vmatprep.subr.msk.mxu0 %vm220_vm2, %v404_v30 }
  0x8e   : > { %1129 = vmatpush1.msk.msra.mxu1 %vm220_vm2, %v310_v27  ;;  %v494_v32 = vpop.permute.xlu1 %493  ;;  %1133 = vmatpush1.msk.msra.mxu0 %vm220_vm2, %v403_v29 }
  0x8f   : > { %v492_v33 = vpop.permute.xlu0 %491  ;;  %1130 = vmatmul.mubr.msk.f32.vlgmr.msra.gmra.mxu1 %vm216_vm3, %v1127_v28  ;;  %1134 = vmatmul.mubr.msk.f32.vlgmr.msra.gmra.mxu0 %vm216_vm3, %v1131_v31 }
  0x90   : > { %v497_v34 = vsel %vm495_vm8, %v492_v33, %v494_v32  ;;  %577 = vmatprep.mubr.f32.mxu1 %v1191_v4  ;;  %668 = vmatprep.mubr.f32.mxu0 %v1191_v4 }
  0x91   : > { %v501_v35 = vsel %vm1248_vm1, %v497_v34, 0.0 }
  0x92   : > { %1136 = vmatprep.subr.msk.mxu1 %vm220_vm2, %v501_v35  ;;  %v591_v36 = vpop.permute.xlu1 %590 }
  0x93   : > { %v490_v37 = vpop.permute.xlu0 %489 }
  0x94   : > { %v496_v38 = vsel %vm495_vm8, %v490_v37, %v492_v33 }
  0x95   : > { %v500_v40 = vsel %vm1244_vm0, %v496_v38, 0.0 }
  0x96   : > { %1137 = vmatpush1.msk.msra.mxu1 %vm220_vm2, %v500_v40  ;;  %v589_v41 = vpop.permute.xlu1 %588 }
  0x97   : > { %v593_v42 = vpop.permute.xlu0 %592  ;;  %1138 = vmatmul.mubr.msk.f32.vlgmr.msra.gmra.mxu1 %vm216_vm3, %v1135_v39  ;;  %v595_v43 = vsel %vm594_vm9, %v589_v41, %v591_v36 }
  0x98   : > { %v596_v44 = vsel %vm594_vm9, %v591_v36, %v593_v42  ;;  %765 = vmatprep.mubr.f32.mxu1 %v1191_v4 }
  0x99   : > { %1140 = vmatprep.subr.msk.mxu0 %vm220_vm2, %v596_v44 }
  0x9a   : > { %1141 = vmatpush1.msk.msra.mxu0 %vm220_vm2, %v595_v43  ;;  %v682_v46 = vpop.permute.xlu1 %681 }
  0x9b   : > { %v680_v47 = vpop.permute.xlu0 %679  ;;  %1142 = vmatmul.mubr.msk.f32.vlgmr.msra.gmra.mxu0 %vm216_vm3, %v1139_v45 }
  0x9c   : > { %v685_v48 = vsel %vm683_vm10, %v680_v47, %v682_v46  ;;  %862 = vmatprep.mubr.f32.mxu0 %v1191_v4 }
  0x9d   : > { %v689_v49 = vsel %vm1270_vm7, %v685_v48, 0.0 }
  0x9e   : > { %1144 = vmatprep.subr.msk.mxu1 %vm220_vm2, %v689_v49  ;;  %v777_v50 = vpop.permute.xlu1 %776 }
  0x9f   : > { %v678_v51 = vpop.permute.xlu0 %677 }
  0xa0   : > { %v684_v52 = vsel %vm683_vm10, %v678_v51, %v680_v47 }
  0xa1   : > { %v688_v54 = vsel %vm1266_vm6, %v684_v52, 0.0 }
  0xa2   : > { %1145 = vmatpush1.msk.msra.mxu1 %vm220_vm2, %v688_v54  ;;  %v775_v55 = vpop.permute.xlu1 %774 }
  0xa3   : > { %v779_v56 = vpop.permute.xlu0 %778  ;;  %1146 = vmatmul.mubr.msk.f32.vlgmr.msra.gmra.mxu1 %vm216_vm3, %v1143_v53  ;;  %v781_v57 = vsel %vm780_vm11, %v775_v55, %v777_v50 }
  0xa4   : > { %v782_v58 = vsel %vm780_vm11, %v777_v50, %v779_v56  ;;  %953 = vmatprep.mubr.f32.mxu1 %v1191_v4  ;;  %v785_v59 = vsel %vm1244_vm0, %v781_v57, 0.0 }
  0xa5   : > { %v786_v60 = vsel %vm1248_vm1, %v782_v58, 0.0 }
  0xa6   : > { %1148 = vmatprep.subr.msk.mxu0 %vm220_vm2, %v786_v60  ;;  %v878_v62 = vpop.permute.xlu1 %877 }
  0xa7   : > { %v876_v63 = vpop.permute.xlu0 %875  ;;  %1149 = vmatpush1.msk.msra.mxu0 %vm220_vm2, %v785_v59 }
  0xa8   : > { %v881_v0 = vsel %vm879_vm12, %v876_v63, %v878_v62  ;;  %1150 = vmatmul.mubr.msk.f32.vlgmr.msra.gmra.mxu0 %vm216_vm3, %v1147_v61 }
  0xa9   : > { %1152 = vmatprep.subr.msk.mxu1 %vm220_vm2, %v881_v0  ;;  %1050 = vmatprep.mubr.f32.mxu0 %v1191_v4 }
  0xaa   : > { %v965_v1 = vpop.permute.xlu1 %964 }
  0xab   : > { %v874_v2 = vpop.permute.xlu0 %873 }
  0xac   : > { %v880_v5 = vsel %vm879_vm12, %v874_v2, %v876_v63 }
  0xad   : > { %1153 = vmatpush1.msk.msra.mxu1 %vm220_vm2, %v880_v5 }
  0xae   : > { %1154 = vmatmul.mubr.msk.f32.vlgmr.msra.gmra.mxu1 %vm216_vm3, %v1151_v3  ;;  %v963_v6 = vpop.permute.xlu1 %962 }
  0xaf   : > { %v967_v7 = vpop.permute.xlu0 %966  ;;  %v969_v8 = vsel %vm968_vm13, %v963_v6, %v965_v1 }
  0xb0   : > { %v970_v9 = vsel %vm968_vm13, %v965_v1, %v967_v7  ;;  %v973_v10 = vsel %vm1266_vm6, %v969_v8, 0.0 }
  0xb1   : > { %v974_v4 = vsel %vm1270_vm7, %v970_v9, 0.0 }
  0xb2   : > { %1156 = vmatprep.subr.msk.mxu0 %vm220_vm2, %v974_v4 }
  0xb3   : > { %1157 = vmatpush1.msk.msra.mxu0 %vm220_vm2, %v973_v10 }
  0xb4   : > { %1158 = vmatmul.mubr.msk.f32.vlgmr.msra.gmra.mxu0 %vm216_vm3, %v1155_v11 }
  0xbc   : > { %v208_v13 = vpop.permute.xlu0 %207 }
  0xd7   : > { %v293_v12 = vpop.f32.mrf.mxu0 }
  0xd8   : > { %v298_v14 = vadd.f32 %v293_v12, %v208_v13 }
  0xd9   : > { %v295_v16 = vpop.f32.mrf.mxu0 }
  0xda   : > { %v299_v17 = vadd.f32 %v295_v16, %v208_v13 }
 0x14f   : > { %v385_v15 = vpop.f32.mrf.mxu1  ;;  %v482_v20 = vpop.f32.mrf.mxu0 }
 0x150   : > { %v390_v18 = vadd.f32 %v385_v15, %v298_v14 }
 0x151   : > { %v387_v19 = vpop.f32.mrf.mxu1  ;;  %v484_v23 = vpop.f32.mrf.mxu0 }
 0x152   : > { %v391_v21 = vadd.f32 %v387_v19, %v299_v17  ;;  %v487_v22 = vadd.f32 %v482_v20, %v390_v18 }
 0x154   : > { %v488_v25 = vadd.f32 %v484_v23, %v391_v21 }
 0x157   : > { %v579_v24 = vpop.f32.mrf.mxu1 }
 0x158   : > { %v584_v26 = vadd.f32 %v579_v24, %v487_v22 }
 0x159   : > { %v581_v27 = vpop.f32.mrf.mxu1 }
 0x15a   : > { %v585_v29 = vadd.f32 %v581_v27, %v488_v25 }
 0x15b   : > { %v670_v28 = vpop.f32.mrf.mxu0 }
 0x15c   : > { %v675_v30 = vadd.f32 %v670_v28, %v584_v26 }
 0x15d   : > { %v672_v31 = vpop.f32.mrf.mxu0 }
 0x15e   : > { %v676_v33 = vadd.f32 %v672_v31, %v585_v29 }
 0x163   : > { %v767_v32 = vpop.f32.mrf.mxu1 }
 0x164   : > { %v772_v34 = vadd.f32 %v767_v32, %v675_v30 }
 0x165   : > { %v769_v35 = vpop.f32.mrf.mxu1 }
 0x166   : > { %v773_v37 = vadd.f32 %v769_v35, %v676_v33 }
 0x168   : > { %v864_v36 = vpop.f32.mrf.mxu0 }
 0x169   : > { %v869_v38 = vadd.f32 %v864_v36, %v772_v34 }
 0x16a   : > { %v866_v39 = vpop.f32.mrf.mxu0 }
 0x16b   : > { %v870_v41 = vadd.f32 %v866_v39, %v773_v37 }
 0x16e   : > { %v955_v40 = vpop.f32.mrf.mxu1 }
 0x16f   : > { %v960_v42 = vadd.f32 %v955_v40, %v869_v38 }
 0x170   : > { %v957_v43 = vpop.f32.mrf.mxu1 }
 0x171   : > { %v961_v45 = vadd.f32 %v957_v43, %v870_v41 }
 0x174   : > { %v1052_v44 = vpop.f32.mrf.mxu0 }
 0x175   : > { %v1057_v46 = vadd.f32 %v1052_v44, %v960_v42 }
 0x176   : > { %v1054_v47 = vpop.f32.mrf.mxu0 }
 0x177   : > { %1059 = vst [vmem:[%s170_s24] sm:$0xff] %v1057_v46  ;;  %v1058_v48 = vadd.f32 %v1054_v47, %v961_v45 }
 0x179   : > { %1060 = vst [vmem:[%s170_s24 + $0x8] sm:$0xff] %v1058_v48 }
 0x17a PF: > { %s13_s12 = sadd.s32 1, %s1189_s12  }
 0x17b   : > { %p10_p4 = scmp.ge.s32.totalorder %s13_s12, 4  }
 0x17d   :  { %12 = sbr.rel (!%p10_p4) target bundleno = 1 (0x1), region = 70 }

</bundles_post_ra>
